<compile_context>
chip_gen: v7x
topology: tpu7x:2x2x1
jax: 0.10.0
libtpu: 0.0.40
codegen_flags: <defaults>
</compile_context>

<pallas_src>
import jax
import jax.numpy as jnp
from jax import lax
from jax.experimental import pallas as pl
from jax.experimental.pallas import tpu as pltpu


# ---------------------------------------------------------------------------
# Fast path: in_fea == 1 and out_fea == 1  ->  y = w * x + b  on the VPU.
# ---------------------------------------------------------------------------
def _affine_kernel(w_ref, b_ref, x_ref, o_ref):
    # w_ref, b_ref : (1,) float32 scalars in SMEM
    # x_ref, o_ref : (block_rows, 128) lane-dense blocks in VMEM
    w = w_ref[0]
    b = b_ref[0]
    o_ref[...] = (x_ref[...].astype(jnp.float32) * w + b).astype(o_ref.dtype)


def _affine_forward(x, weight, bias):
    B = x.shape[0]
    lanes = 128
    rows = pl.cdiv(B, lanes)
    total = rows * lanes

    xf = x.reshape(B)
    if total != B:
        # Only needed when B is not a multiple of 128 (not the 512-sample case).
        xf = jnp.pad(xf, (0, total - B))
    x2 = xf.reshape(rows, lanes)  # lane-dense: 128-wide last dim

    # Whole-(8,128)-vreg row blocks once there are >= 8 rows; cap at 1024 rows
    # (~512 KiB f32 tiles) so big batches get pipelined double-buffered DMAs.
    if rows <= 8:
        block_rows = rows                       # single full block (tiny B)
    else:
        block_rows = min(1024, (rows // 8) * 8)  # multiple of 8 sublanes
    grid = (pl.cdiv(rows, block_rows),)

    # Parameters stay f32 regardless of x dtype (compute in f32, cast at store).
    w = weight.reshape(1).astype(jnp.float32)
    b = bias.reshape(1).astype(jnp.float32)

    out = pl.pallas_call(
        _affine_kernel,
        out_shape=jax.ShapeDtypeStruct((rows, lanes), x.dtype),
        grid=grid,
        in_specs=[
            pl.BlockSpec(memory_space=pltpu.MemorySpace.SMEM),    # w (scalar)
            pl.BlockSpec(memory_space=pltpu.MemorySpace.SMEM),    # b (scalar)
            pl.BlockSpec((block_rows, lanes), lambda i: (i, 0)),  # x
        ],
        out_specs=pl.BlockSpec((block_rows, lanes), lambda i: (i, 0)),
        compiler_params=pltpu.CompilerParams(
            dimension_semantics=("parallel",),        # v7x: shard rows over 2 TCs
            vmem_limit_bytes=32 * 1024 * 1024),
        cost_estimate=pl.CostEstimate(
            flops=2 * total,
            transcendentals=0,
            bytes_accessed=2 * total * x.dtype.itemsize + 8),
    )(w, b, x2)

    if total != B:
        return out.reshape(total, 1)[:B, :]
    return out.reshape(B, 1)


# ---------------------------------------------------------------------------
# General nn.Linear path: (M, N, K)-tiled MXU matmul with a f32 accumulator.
# ---------------------------------------------------------------------------
def _make_linear_kernel(use_bf16_inputs):
    def kernel(x_ref, w_ref, b_ref, o_ref, acc_ref):
        # x_ref : (tm, tk)   VMEM
        # w_ref : (tn, tk)   VMEM (stored layout, contracted on its last dim)
        # b_ref : (1,  tn)   VMEM
        # o_ref : (tm, tn)   VMEM
        # acc   : (tm, tn)   VMEM f32 scratch, resident across the K axis
        @pl.when(pl.program_id(2) == 0)
        def _init():
            acc_ref[...] = jnp.zeros_like(acc_ref)

        a = x_ref[...]
        w = w_ref[...]
        if use_bf16_inputs:
            # Opt-in: bf16 operands ~2-4x MXU throughput; accumulation stays f32.
            a = a.astype(jnp.bfloat16)
            w = w.astype(jnp.bfloat16)

        # x @ weight.T done in-kernel (no wrapper transpose / extra HBM pass).
        acc_ref[...] += lax.dot_general(
            a, w,
            dimension_numbers=(((1,), (1,)), ((), ())),
            preferred_element_type=jnp.float32)

        @pl.when(pl.program_id(2) == pl.num_programs(2) - 1)
        def _store():
            o_ref[...] = (acc_ref[...]
                          + b_ref[...].astype(jnp.float32)).astype(o_ref.dtype)

    return kernel


def _round_up(v, m):
    return ((v + m - 1) // m) * m


def _general_forward(x, weight, bias, *, use_bf16_inputs=False):
    B, in_fea = x.shape
    out_fea = weight.shape[0]

    # Tile sizes: full dims for small problems; 256/256/512 (multiples of both
    # the v5e 128-wide and v6e/v7x 256-wide MXU) once tiling kicks in.  The
    # per-step VMEM footprint stays ~2-3 MiB, safe on every generation.
    tm = B if B <= 256 else 256
    tn = out_fea if out_fea <= 256 else 256
    if in_fea <= 512:
        tk = in_fea
        xk, wk = x, weight
    else:
        # Zero-pad K so the reduction axis divides evenly (zeros contribute 0).
        tk = 512
        k_pad = _round_up(in_fea, tk) - in_fea
        xk = jnp.pad(x, ((0, 0), (0, k_pad)))
        wk = jnp.pad(weight, ((0, 0), (0, k_pad)))
    K = xk.shape[1]

    b2 = bias.reshape(1, out_fea)
    grid = (pl.cdiv(B, tm), pl.cdiv(out_fea, tn), K // tk)

    cost = pl.CostEstimate(
        flops=2 * B * in_fea * out_fea,
        transcendentals=0,
        bytes_accessed=(B * in_fea + out_fea * in_fea + B * out_fea + out_fea)
        * x.dtype.itemsize)

    return pl.pallas_call(
        _make_linear_kernel(use_bf16_inputs),
        out_shape=jax.ShapeDtypeStruct((B, out_fea), x.dtype),
        grid=grid,
        in_specs=[
            pl.BlockSpec((tm, tk), lambda i, j, k: (i, k)),   # x
            pl.BlockSpec((tn, tk), lambda i, j, k: (j, k)),   # weight (as stored)
            pl.BlockSpec((1, tn), lambda i, j, k: (0, j)),    # bias
        ],
        out_specs=pl.BlockSpec((tm, tn), lambda i, j, k: (i, j)),
        scratch_shapes=[pltpu.VMEM((tm, tn), jnp.float32)],
        compiler_params=pltpu.CompilerParams(
            dimension_semantics=("parallel", "parallel", "arbitrary"),
            vmem_limit_bytes=32 * 1024 * 1024),
        cost_estimate=cost,
    )(xk, wk, b2)


def linear_forward(x, weight, bias):
    """y = x @ weight.T + bias  (PyTorch nn.Linear semantics).

    x:      (B, in_fea)        float32
    weight: (out_fea, in_fea)  float32
    bias:   (out_fea,)         float32
    returns (B, out_fea)       float32
    """
    out_fea, in_fea = weight.shape
    if in_fea == 1 and out_fea == 1:
        return _affine_forward(x, weight, bias)
    # TODO(synk): for 1 < out_fea < 128 a VPU broadcast-multiply + row-reduce
    # route with a lane-dense reshaped output would avoid a degenerate N<128
    # MXU matmul and masked vst.msk stores; the MXU path below is correct but
    # wastes most of the systolic array for such narrow outputs.
    return _general_forward(x, weight, bias)


if __name__ == "__main__":
    # Linear-regression shapes from the PyTorch script: 512 samples, 1 -> 1.
    B, in_fea, out_fea = 512, 1, 1

    key = jax.random.PRNGKey(0)
    kx, kw, kb, kx2, kw2, kb2 = jax.random.split(key, 6)

    x = jax.random.uniform(kx, (B, in_fea), dtype=jnp.float32)

    # Deterministic parameter init, matching PyTorch's U(-1/sqrt(in), 1/sqrt(in)).
    bound = 1.0 / (in_fea ** 0.5)
    weight = jax.random.uniform(
        kw, (out_fea, in_fea), dtype=jnp.float32, minval=-bound, maxval=bound)
    bias = jax.random.uniform(
        kb, (out_fea,), dtype=jnp.float32, minval=-bound, maxval=bound)

    fwd = jax.jit(linear_forward)
    y = fwd(x, weight, bias)
    jax.block_until_ready(y)

    y_ref = x @ weight.T + bias
    assert y.shape == (B, out_fea)
    assert jnp.allclose(y, y_ref, atol=1e-5, rtol=1e-5)

    # Also exercise the general tiled MXU path at a small shape.
    B2, fin2, fout2 = 64, 32, 8
    x2 = jax.random.normal(kx2, (B2, fin2), dtype=jnp.float32)
    w2 = jax.random.normal(kw2, (fout2, fin2), dtype=jnp.float32) * 0.1
    b2 = jax.random.normal(kb2, (fout2,), dtype=jnp.float32) * 0.1
    y2 = jax.jit(linear_forward)(x2, w2, b2)
    jax.block_until_ready(y2)
    y2_ref = x2 @ w2.T + b2
    assert y2.shape == (B2, fout2)
    assert jnp.allclose(y2, y2_ref, atol=1e-4, rtol=1e-4)

    print("KERNEL_OK")
</pallas_src>

<mosaic_0001>
module attributes {stable_mosaic.version = 11 : i64} {
  func.func @_affine_kernel(%arg0: i32, %arg1: memref<1xf32, #tpu.memory_space<smem>>, %arg2: memref<1xf32, #tpu.memory_space<smem>>, %arg3: memref<4x128xf32, #tpu.memory_space<vmem>>, %arg4: memref<4x128xf32, #tpu.memory_space<vmem>>) attributes {dimension_semantics = [#tpu.dimension_semantics<parallel>], iteration_bounds = array<i64: 1>, scalar_prefetch = 0 : i64, scratch_operands = 0 : i64, tpu.core_type = #tpu.core_type<tc>, window_params = [{transform_indices = @transform_0, window_bounds = array<i64: 1>}, {transform_indices = @transform_1, window_bounds = array<i64: 1>}, {transform_indices = @transform_2, window_bounds = array<i64: 4, 128>}, {transform_indices = @transform_3, window_bounds = array<i64: 4, 128>}]} {
    %c0 = arith.constant 0 : index
    %0 = memref.load %arg1[%c0] : memref<1xf32, #tpu.memory_space<smem>>
    %c0_0 = arith.constant 0 : index
    %1 = memref.load %arg2[%c0_0] : memref<1xf32, #tpu.memory_space<smem>>
    %c0_1 = arith.constant 0 : index
    %c0_2 = arith.constant 0 : index
    %2 = vector.load %arg3[%c0_1, %c0_2] : memref<4x128xf32, #tpu.memory_space<vmem>>, vector<4x128xf32>
    %3 = vector.broadcast %0 : f32 to vector<4x128xf32>
    %4 = arith.mulf %2, %3 : vector<4x128xf32>
    %5 = vector.broadcast %1 : f32 to vector<4x128xf32>
    %6 = arith.addf %4, %5 : vector<4x128xf32>
    %c0_3 = arith.constant 0 : index
    %c0_4 = arith.constant 0 : index
    %7 = vector.load %arg4[%c0_3, %c0_4] : memref<4x128xf32, #tpu.memory_space<vmem>>, vector<4x128xf32>
    tpu.vector_store %arg4[%c0_3, %c0_4], %6 {strides = array<i32>} : memref<4x128xf32, #tpu.memory_space<vmem>>, vector<4x128xf32>,
    return
  }
  func.func @transform_0(%arg0: i32) -> i32 {
    %c0_i32 = arith.constant 0 : i32
    %c0_i32_0 = arith.constant 0 : i32
    return %c0_i32 : i32
  }
  func.func @transform_1(%arg0: i32) -> i32 {
    %c0_i32 = arith.constant 0 : i32
    %c0_i32_0 = arith.constant 0 : i32
    return %c0_i32 : i32
  }
  func.func @transform_2(%arg0: i32) -> (i32, i32) {
    %c0_i32 = arith.constant 0 : i32
    %c0_i32_0 = arith.constant 0 : i32
    return %arg0, %c0_i32 : i32, i32
  }
  func.func @transform_3(%arg0: i32) -> (i32, i32) {
    %c0_i32 = arith.constant 0 : i32
    %c0_i32_0 = arith.constant 0 : i32
    return %arg0, %c0_i32 : i32, i32
  }
}

</mosaic_0001>

<bundles_post_ra>
// kernel: linear_forward.1
= control target key start
LH: loop header
LB: loop body
LE: loop exit
PB: predicated region body
PF: predicated region fallthrough
CT: control target
= control target key end

     0   :  { %s106_s0 = inlined_call_operand.<no memory space> [shape: f32[1], index: 0, kind: input, shape index: {}]   ;;  %s107_s1 = inlined_call_operand.<no memory space> [shape: f32[1], index: 1, kind: input, shape index: {}]   ;;  %s108_s2 = inlined_call_operand.vmem [shape: f32[4,128], index: 2, kind: input, shape index: {}]   ;;  %s109_s3 = inlined_call_operand.hbm [shape: f32[4,128], index: 3, kind: output, shape index: {}]  }
   0x1   :  { %v19_v0 = vld [vmem:[%s108_s2] sm:$0xf]  ;;  %v20_v1 = vstv %s106_s0  ;;  %v22_v2 = vstv %s107_s1 }
   0x2   :  { %10 = vsyncpa [#allocation5], 0  ;;  %v21_v3 = vmul.f32 %v20_v1, %v19_v0  ;;  %s64_s18 = smov [#allocation4]  }
   0x3   :  { %s31_s19 = sshll.u32 %s64_s18, 4  ;;  %s32_s19 = int_to_ptr.vmem [resolvable:$true] %s31_s19 }
   0x4   :  { %v23_v4 = vadd.f32 %v22_v2, %v21_v3  ;;  %s40_s20 = scalar_lea.vmem %s32_s19, 64  ;;  %p45_p1 = scmp.lt.s32.totalorder %s32_s19, %s32_s19 }
   0x5   :  { %p41_p0 = scmp.ne.s32.totalorder %s32_s19, %s40_s20  ;;  %p46_p2 = scmp.lt.s32.totalorder %s40_s20, %s40_s20 }
   0x6   :  { %24 = vst [vmem:[#allocation4] sm:$0xf] %v23_v4 }
   0x7   :  { %p47_p3 = por %p46_p2, %p45_p1 }
   0x9   :  { %p48_p4 = pnand %p47_p3, %p41_p0 }
   0xb   :  { %51 = shalt.err (!%p48_p4)
}
   0xc   :  { %s52_s21 = scalar_lea.hbm %s109_s3, 64 }
   0xd   :  { %p53_p5 = scmp.ne.s32.totalorder %s109_s3, %s52_s21  ;;  %p56_p6 = scmp.lt.u32.totalorder %s52_s21, %s109_s3 }
   0xf   :  { %p58_p7 = pnand %p56_p6, %p53_p5 }
  0x11   :  { %61 = shalt.err (!%p58_p7)
}
  0x12   :  { %34 = dma.vmem_to_hbm [thread:$0]  %s32_s19, 64, %s109_s3, [#allocation5]  }
  0x13   :  { %62 = dma.done.wait [#allocation5], 64  }
  0x14   :  { %63 = vsyncadd [#allocation5], 4294967232 }
  0x15   :  { %38 = vsyncpa [#allocation5], 1 }

</bundles_post_ra>
